<compile_context>
chip_gen: v7x
topology: tpu7x:2x2x1
jax: 0.10.0
libtpu: 0.0.40
codegen_flags: <defaults>
</compile_context>

<pallas_src>
import math

import jax
import jax.numpy as jnp
import numpy as np
from jax.experimental import pallas as pl
from jax.experimental.pallas import tpu as pltpu


def _round_up(x: int, m: int) -> int:
    return ((x + m - 1) // m) * m


def _dropout_keep_mask(key, shape, dropout_prob):
    """float32 {0,1} keep-mask with P(keep) = 1 - p (inverted-dropout semantics)."""
    # TODO(synk): not bit-identical to torch.nn.Dropout's RNG stream (statistically equiv.).
    return jax.random.bernoulli(key, 1.0 - float(dropout_prob), shape).astype(jnp.float32)


def _make_kernel(use_dropout: bool, compute_dtype):
    def kernel(*refs):
        if use_dropout:
            x_ref, w1_ref, w2_ref, mask_ref, out_ref, acc_ref = refs
        else:
            x_ref, w1_ref, w2_ref, out_ref, acc_ref = refs
            mask_ref = None

        k = pl.program_id(1)  # K (input-feature) reduction axis, last in the grid

        @pl.when(k == 0)
        def _init():
            acc_ref[...] = jnp.zeros_like(acc_ref)

        # ---- first layer: X @ W1^T on the MXU (torch-layout W1, trans_b native) ----
        # X streams in its stored dtype and is cast here (no extra wrapper HBM pass);
        # accumulation is always f32 via preferred_element_type.
        acc_ref[...] += jax.lax.dot_general(
            x_ref[...].astype(compute_dtype),
            w1_ref[...],
            dimension_numbers=(((1,), (1,)), ((), ())),
            preferred_element_type=jnp.float32,
        )

        @pl.when(k == pl.num_programs(1) - 1)
        def _finish():
            hidden = jax.nn.sigmoid(acc_ref[...])  # (tb, H) f32 on the EUP
            if use_dropout:
                # keep-scale is folded into w2, so dropout is a single VPU multiply here
                hidden = hidden * mask_ref[...]
            # ---- second layer (out_features == 1): contract H -> lane-dense (1, tb) ----
            pred = jax.lax.dot_general(
                w2_ref[...],
                hidden,
                dimension_numbers=(((1,), (1,)), ((), ())),
                preferred_element_type=jnp.float32,
            )
            out_ref[...] = pred[None].astype(out_ref.dtype)  # (1, 1, tb) lane-dense store

    return kernel


def two_layer_fa_dropout_sigmoid(
    x,
    w1,
    w2,
    *,
    dropout_prob: float,
    training: bool = True,
    dropout_key=None,
    compute_dtype=jnp.bfloat16,
    block_b=None,
    block_f=None,
):
    """Forward pass of TwoLayerFeedbackAlignmentDropoutNetworkSigmoid.

    x  : (B, F)  input batch
    w1 : (H, F)  first_layer weight (torch layout, used as-is, no transpose)
    w2 : (1, H)  second_layer weight (torch layout, used as-is, no transpose)
    returns (B, 1) float32
    """
    x = jnp.asarray(x)
    w1 = jnp.asarray(w1)
    w2 = jnp.asarray(w2)
    B, F = x.shape
    H = w1.shape[0]
    assert w1.shape == (H, F) and w2.shape == (1, H)

    if training and dropout_prob >= 1.0:
        # nn.Dropout(p=1) zeroes every activation -> the prediction is exactly zero.
        return jnp.zeros((B, 1), jnp.float32)

    use_dropout = bool(training) and dropout_prob > 0.0
    keep_scale = 1.0 / (1.0 - dropout_prob) if use_dropout else 1.0
    inv_sqrt_h = 1.0 / math.sqrt(H)

    # Fold the dropout keep-scale and the 1/sqrt(H) output scale into W2 once (free (1,H)).
    w2_scaled = w2.astype(jnp.float32) * np.float32(keep_scale * inv_sqrt_h)

    # W1 lives in VMEM in compute dtype (bf16 halves residency + DMA bytes).
    w1_c = w1.astype(compute_dtype)
    w1_item = np.dtype(compute_dtype).itemsize
    x_item = np.dtype(x.dtype).itemsize

    # ---- generation-aware VMEM budget (v5e/v6e: 128 MiB, v7x: 64 MiB per TC) ----
    try:
        vmem_cap = int(pltpu.get_tpu_info().vmem_capacity_bytes)
    except Exception:
        vmem_cap = 64 * 2**20  # conservative fallback (also fine for interpret mode)
    budget = int(0.85 * vmem_cap)

    # ---- K (input-feature) tiling: keep W1 resident when it fits, else stream K slices ----
    tk = F
    if block_f is not None:
        if block_f < F and F % block_f == 0 and block_f % 128 == 0:
            tk = block_f
    elif 2 * H * F * w1_item > budget // 2 and F % 128 == 0:
        cand = max(128, ((budget // 2) // (2 * H * w1_item)) // 128 * 128)
        while cand > 128 and F % cand != 0:
            cand -= 128
        if F % cand == 0:
            tk = cand
        # TODO(synk): if F has no suitable 128-multiple divisor, W1 stays unsplit and a very
        # large layer may exceed the v7x VMEM budget (would need a masked ragged-K tail).
    grid_k = pl.cdiv(F, tk)

    # ---- batch tiling (no wrapper pad: the last tile may over-cover; rows are discarded) ----
    if B <= 8:
        tb = B
    else:
        row_bytes = H * 4 + 2 * tk * x_item + (2 * H * 4 if use_dropout else 0) + 8
        avail = budget - 2 * H * tk * w1_item - 2 * H * 4
        tb_vmem = (max(avail, 0) // max(row_bytes, 1)) // 8 * 8
        tb = max(8, min(2048, max(tb_vmem, 8)))
        if block_b is not None:
            tb = min(tb, max(8, (block_b // 8) * 8))
        if B >= 16:
            # keep at least two batch tiles so the "parallel" axis spans both v7x TCs
            tb = min(tb, _round_up(pl.cdiv(B, 2), 8))
        tb = min(tb, _round_up(B, 8))
        grid_b = pl.cdiv(B, tb)
        tb = min(tb, _round_up(pl.cdiv(B, grid_b), 8))  # minimize ragged-tail overshoot
    grid_b = pl.cdiv(B, tb)

    kernel = _make_kernel(use_dropout, compute_dtype)

    in_specs = [
        pl.BlockSpec((tb, tk), lambda i, k: (i, k)),  # X: streams over batch (and K)
        pl.BlockSpec((H, tk), lambda i, k: (0, k)),   # W1: resident across batch tiles
        pl.BlockSpec((1, H), lambda i, k: (0, 0)),    # scaled W2: resident, lane-dense
    ]
    inputs = [x, w1_c, w2_scaled]
    if use_dropout:
        if dropout_key is None:
            dropout_key = jax.random.PRNGKey(0)
        mask = _dropout_keep_mask(dropout_key, (B, H), dropout_prob)
        in_specs.append(pl.BlockSpec((tb, H), lambda i, k: (i, 0)))  # constant over K: no re-DMA
        inputs.append(mask)

    # Lane-dense output: one (1, tb) row per batch tile, reshaped to (B, 1) by the wrapper.
    out_spec = pl.BlockSpec((1, 1, tb), lambda i, k: (i, 0, 0))

    grid_spec = pltpu.PrefetchScalarGridSpec(
        num_scalar_prefetch=0,
        grid=(grid_b, grid_k),
        in_specs=in_specs,
        out_specs=out_spec,
        scratch_shapes=[pltpu.VMEM((tb, H), jnp.float32)],  # f32 accumulator / hidden
    )

    need = (
        2 * tb * tk * x_item              # X double-buffer
        + 2 * H * tk * w1_item            # W1 double-buffer
        + 2 * H * 4                       # scaled W2
        + tb * H * 4                      # accumulator scratch
        + (2 * tb * H * 4 if use_dropout else 0)  # mask double-buffer
        + 2 * tb * 4                      # output tile
    )
    vmem_limit = int(min(int(0.9 * vmem_cap), max(need + (2 << 20), 16 << 20)))

    out = pl.pallas_call(
        kernel,
        out_shape=jax.ShapeDtypeStruct((grid_b, 1, tb), jnp.float32),
        grid_spec=grid_spec,
        compiler_params=pltpu.CompilerParams(
            dimension_semantics=("parallel", "arbitrary"),
            vmem_limit_bytes=vmem_limit,
        ),
    )(*inputs)

    return out.reshape(grid_b * tb, 1)[:B]


if __name__ == "__main__":
    batch = 8
    input_features = 32
    hidden_features = 32
    dropout_prob = 0.1

    key = jax.random.PRNGKey(0)
    kx, k1, k2, kd = jax.random.split(key, 4)

    x = jax.random.normal(kx, (batch, input_features), jnp.float32)
    bound1 = 1.0 / math.sqrt(input_features)
    bound2 = 1.0 / math.sqrt(hidden_features)
    w1 = jax.random.uniform(
        k1, (hidden_features, input_features), jnp.float32, -bound1, bound1
    )
    w2 = jax.random.uniform(k2, (1, hidden_features), jnp.float32, -bound2, bound2)

    def ref_forward(x_, w1_, w2_, keep_mask=None, keep_scale=1.0):
        x64 = np.asarray(x_, np.float64)
        w1_64 = np.asarray(w1_, np.float64)
        w2_64 = np.asarray(w2_, np.float64)
        h = 1.0 / (1.0 + np.exp(-(x64 @ w1_64.T)))
        if keep_mask is not None:
            h = np.where(np.asarray(keep_mask) != 0, h * keep_scale, 0.0)
        return (h @ w2_64.T) / math.sqrt(w1_64.shape[0])

    # ---- eval mode, f32 compute path ----
    out_eval = jax.block_until_ready(
        two_layer_fa_dropout_sigmoid(
            x, w1, w2, dropout_prob=dropout_prob, training=False,
            compute_dtype=jnp.float32,
        )
    )
    np.testing.assert_allclose(
        np.asarray(out_eval), ref_forward(x, w1, w2), rtol=5e-3, atol=5e-3
    )

    # ---- eval mode, default bf16 MXU path ----
    out_bf16 = jax.block_until_ready(
        two_layer_fa_dropout_sigmoid(x, w1, w2, dropout_prob=dropout_prob, training=False)
    )
    np.testing.assert_allclose(
        np.asarray(out_bf16), ref_forward(x, w1, w2), rtol=2e-2, atol=5e-3
    )

    # ---- training mode: deterministic host-side keep mask, exact mask-based reference ----
    out_train = jax.block_until_ready(
        two_layer_fa_dropout_sigmoid(
            x, w1, w2, dropout_prob=dropout_prob, training=True,
            dropout_key=kd, compute_dtype=jnp.float32,
        )
    )
    keep = _dropout_keep_mask(kd, (batch, hidden_features), dropout_prob)
    ref_train = ref_forward(
        x, w1, w2, keep_mask=keep, keep_scale=1.0 / (1.0 - dropout_prob)
    )
    assert out_train.shape == (batch, 1)
    np.testing.assert_allclose(np.asarray(out_train), ref_train, rtol=5e-3, atol=5e-3)

    # ---- larger config: K-split grid (grid_k=2), ragged batch tiles (grid_b=4), dropout ----
    B2, F2, H2 = 28, 256, 128
    kx2, k1b, k2b, kd2 = jax.random.split(jax.random.PRNGKey(1), 4)
    x2 = jax.random.normal(kx2, (B2, F2), jnp.float32)
    w1b = jax.random.uniform(
        k1b, (H2, F2), jnp.float32, -1.0 / math.sqrt(F2), 1.0 / math.sqrt(F2)
    )
    w2b = jax.random.uniform(
        k2b, (1, H2), jnp.float32, -1.0 / math.sqrt(H2), 1.0 / math.sqrt(H2)
    )

    out_big = jax.block_until_ready(
        two_layer_fa_dropout_sigmoid(
            x2, w1b, w2b, dropout_prob=dropout_prob, training=True,
            dropout_key=kd2, compute_dtype=jnp.float32, block_b=8, block_f=128,
        )
    )
    keep2 = _dropout_keep_mask(kd2, (B2, H2), dropout_prob)
    ref_big = ref_forward(
        x2, w1b, w2b, keep_mask=keep2, keep_scale=1.0 / (1.0 - dropout_prob)
    )
    assert out_big.shape == (B2, 1)
    np.testing.assert_allclose(np.asarray(out_big), ref_big, rtol=5e-3, atol=5e-3)

    # ---- same config on the default bf16 path (also exercises in-kernel f32->bf16 cast) ----
    out_big_bf16 = jax.block_until_ready(
        two_layer_fa_dropout_sigmoid(
            x2, w1b, w2b, dropout_prob=dropout_prob, training=True,
            dropout_key=kd2, block_b=8, block_f=128,
        )
    )
    np.testing.assert_allclose(np.asarray(out_big_bf16), ref_big, rtol=3e-2, atol=1e-2)

    print("KERNEL_OK")
</pallas_src>

<mosaic_0001>
module attributes {stable_mosaic.version = 11 : i64} {
  func.func @kernel(%arg0: i32, %arg1: i32, %arg2: memref<8x32xf32, #tpu.memory_space<vmem>>, %arg3: memref<32x32xf32, #tpu.memory_space<vmem>>, %arg4: memref<1x32xf32, #tpu.memory_space<vmem>>, %arg5: memref<1x1x8xf32, #tpu.memory_space<vmem>>, %arg6: memref<8x32xf32, #tpu.memory_space<vmem>>) attributes {dimension_semantics = [#tpu.dimension_semantics<parallel>, #tpu.dimension_semantics<arbitrary>], iteration_bounds = array<i64: 1, 1>, scalar_prefetch = 0 : i64, scratch_operands = 1 : i64, tpu.core_type = #tpu.core_type<tc>, window_params = [{transform_indices = @transform_0, window_bounds = array<i64: 8, 32>}, {transform_indices = @transform_1, window_bounds = array<i64: 32, 32>}, {pipeline_mode = #tpu.pipeline_mode<synchronous>, transform_indices = @transform_2, window_bounds = array<i64: 1, 32>}, {transform_indices = @transform_3, window_bounds = array<i64: 1, 1, 8>}]} {
    %c0_i32 = arith.constant 0 : i32
    %0 = arith.cmpi eq, %arg1, %c0_i32 : i32
    %1 = arith.extui %0 : i1 to i32
    %c0_i32_0 = arith.constant 0 : i32
    %2 = arith.cmpi ne, %1, %c0_i32_0 : i32
    scf.if %2 {
      %cst_10 = arith.constant 0.000000e+00 : f32
      %12 = vector.broadcast %cst_10 : f32 to vector<8x32xf32>
      %c0_11 = arith.constant 0 : index
      %c0_12 = arith.constant 0 : index
      %13 = vector.load %arg6[%c0_11, %c0_12] : memref<8x32xf32, #tpu.memory_space<vmem>>, vector<8x32xf32>
      tpu.vector_store %arg6[%c0_11, %c0_12], %12 {strides = array<i32>} : memref<8x32xf32, #tpu.memory_space<vmem>>, vector<8x32xf32>,
    } else {
    }
    %c0 = arith.constant 0 : index
    %c0_1 = arith.constant 0 : index
    %3 = vector.load %arg6[%c0, %c0_1] : memref<8x32xf32, #tpu.memory_space<vmem>>, vector<8x32xf32>
    %c0_2 = arith.constant 0 : index
    %c0_3 = arith.constant 0 : index
    %4 = vector.load %arg2[%c0_2, %c0_3] : memref<8x32xf32, #tpu.memory_space<vmem>>, vector<8x32xf32>
    %c0_4 = arith.constant 0 : index
    %c0_5 = arith.constant 0 : index
    %5 = vector.load %arg3[%c0_4, %c0_5] : memref<32x32xf32, #tpu.memory_space<vmem>>, vector<32x32xf32>
    %cst = arith.constant dense<0.000000e+00> : vector<8x32xf32>
    %6 = tpu.matmul %4, %5, %cst {dimension_numbers = #tpu.dot_dimension_numbers<[1], [1], [0], [0], [0, 0, 1, 0], [], []>} : vector<8x32xf32>, vector<32x32xf32>, vector<8x32xf32> -> vector<8x32xf32>
    %7 = arith.addf %3, %6 : vector<8x32xf32>
    %c0_6 = arith.constant 0 : index
    %c0_7 = arith.constant 0 : index
    %8 = vector.load %arg6[%c0_6, %c0_7] : memref<8x32xf32, #tpu.memory_space<vmem>>, vector<8x32xf32>
    tpu.vector_store %arg6[%c0_6, %c0_7], %7 {strides = array<i32>} : memref<8x32xf32, #tpu.memory_space<vmem>>, vector<8x32xf32>,
    %c0_i32_8 = arith.constant 0 : i32
    %9 = arith.cmpi eq, %arg1, %c0_i32_8 : i32
    %10 = arith.extui %9 : i1 to i32
    %c0_i32_9 = arith.constant 0 : i32
    %11 = arith.cmpi ne, %10, %c0_i32_9 : i32
    scf.if %11 {
      %c0_10 = arith.constant 0 : index
      %c0_11 = arith.constant 0 : index
      %12 = vector.load %arg6[%c0_10, %c0_11] : memref<8x32xf32, #tpu.memory_space<vmem>>, vector<8x32xf32>
      %13 = arith.negf %12 : vector<8x32xf32>
      %14 = math.exp %13 : vector<8x32xf32>
      %cst_12 = arith.constant 1.000000e+00 : f32
      %15 = vector.broadcast %cst_12 : f32 to vector<8x32xf32>
      %16 = arith.addf %15, %14 : vector<8x32xf32>
      %17 = arith.divf %15, %16 : vector<8x32xf32>
      %c0_13 = arith.constant 0 : index
      %c0_14 = arith.constant 0 : index
      %18 = vector.load %arg4[%c0_13, %c0_14] : memref<1x32xf32, #tpu.memory_space<vmem>>, vector<1x32xf32>
      %cst_15 = arith.constant dense<0.000000e+00> : vector<1x8xf32>
      %19 = tpu.matmul %18, %17, %cst_15 {dimension_numbers = #tpu.dot_dimension_numbers<[1], [1], [0], [0], [0, 0, 1, 0], [], []>} : vector<1x32xf32>, vector<8x32xf32>, vector<1x8xf32> -> vector<1x8xf32>
      %20 = vector.shape_cast %19 : vector<1x8xf32> to vector<1x1x8xf32>
      %c0_16 = arith.constant 0 : index
      %c0_17 = arith.constant 0 : index
      %c0_18 = arith.constant 0 : index
      %21 = vector.load %arg5[%c0_16, %c0_17, %c0_18] : memref<1x1x8xf32, #tpu.memory_space<vmem>>, vector<1x1x8xf32>
      tpu.vector_store %arg5[%c0_16, %c0_17, %c0_18], %20 {strides = array<i32>} : memref<1x1x8xf32, #tpu.memory_space<vmem>>, vector<1x1x8xf32>,
    } else {
    }
    return
  }
  func.func @transform_0(%arg0: i32, %arg1: i32) -> (i32, i32) {
    %c0_i32 = arith.constant 0 : i32
    return %arg0, %arg1 : i32, i32
  }
  func.func @transform_1(%arg0: i32, %arg1: i32) -> (i32, i32) {
    %c0_i32 = arith.constant 0 : i32
    %c0_i32_0 = arith.constant 0 : i32
    return %c0_i32, %arg1 : i32, i32
  }
  func.func @transform_2(%arg0: i32, %arg1: i32) -> (i32, i32) {
    %c0_i32 = arith.constant 0 : i32
    %c0_i32_0 = arith.constant 0 : i32
    %c0_i32_1 = arith.constant 0 : i32
    return %c0_i32, %c0_i32_0 : i32, i32
  }
  func.func @transform_3(%arg0: i32, %arg1: i32) -> (i32, i32, i32) {
    %c0_i32 = arith.constant 0 : i32
    %c0_i32_0 = arith.constant 0 : i32
    %c0_i32_1 = arith.constant 0 : i32
    return %arg0, %c0_i32, %c0_i32_0 : i32, i32, i32
  }
}

</mosaic_0001>

<bundles_post_ra>
// kernel: tpu_custom_call.1
= control target key start
LH: loop header
LB: loop body
LE: loop exit
PB: predicated region body
PF: predicated region fallthrough
CT: control target
= control target key end

     0   :  { %8 = vsyncpa [#allocation4], 0  ;;  %s450_s0 = inlined_call_operand.hbm [shape: f32[8,32], index: 0, kind: input, shape index: {}]   ;;  %s451_s1 = inlined_call_operand.hbm [shape: f32[32,32], index: 1, kind: input, shape index: {}]   ;;  %s452_s2 = inlined_call_operand.vmem [shape: f32[1,32], index: 2, kind: input, shape index: {}]   ;;  %s453_s3 = inlined_call_operand.hbm [shape: f32[1,1,8], index: 3, kind: output, shape index: {}]  }
   0x1   :  { %9 = vsyncpa [#allocation7], 0 }
   0x2   :  { %10 = vsyncpa [#allocation5], 0  ;;  %s369_s12 = smov [#allocation3]   ;;  %s370_s14 = smov [#allocation6]  }
   0x3   :  { %s17_s13 = sshll.u32 %s369_s12, 4  ;;  %s26_s15 = sshll.u32 %s370_s14, 4  ;;  %s18_s13 = int_to_ptr.vmem [resolvable:$true] %s17_s13  ;;  %s397_s15 = int_to_ptr.vmem [resolvable:$true] %s26_s15 }
   0x4   :  { %s297_s18 = scalar_lea.hbm %s450_s0, 128 }
   0x5   :  { %p298_p0 = scmp.ne.s32.totalorder %s450_s0, %s297_s18  ;;  %p301_p1 = scmp.lt.u32.totalorder %s297_s18, %s450_s0 }
   0x7   :  { %p303_p2 = pnand %p301_p1, %p298_p0 }
   0x9   :  { %306 = shalt.err (!%p303_p2)
}
   0xa   :  { %s307_s23 = scalar_lea.vmem %s18_s13, 128  ;;  %p312_p4 = scmp.lt.s32.totalorder %s18_s13, %s18_s13 }
   0xb   :  { %p308_p3 = scmp.ne.s32.totalorder %s18_s13, %s307_s23  ;;  %p313_p5 = scmp.lt.s32.totalorder %s307_s23, %s307_s23 }
   0xd   :  { %p314_p6 = por %p313_p5, %p312_p4 }
   0xf   :  { %p315_p7 = pnand %p314_p6, %p308_p3 }
  0x11   :  { %318 = shalt.err (!%p315_p7)
}
  0x12   :  { %20 = dma.hbm_to_vmem [thread:$0]  %s450_s0, 128, %s18_s13, [#allocation4]  }
  0x13   :  { %s319_s28 = scalar_lea.hbm %s451_s1, 512 }
  0x14   :  { %p320_p8 = scmp.ne.s32.totalorder %s451_s1, %s319_s28  ;;  %p323_p9 = scmp.lt.u32.totalorder %s319_s28, %s451_s1 }
  0x16   :  { %p325_p10 = pnand %p323_p9, %p320_p8 }
  0x18   :  { %328 = shalt.err (!%p325_p10)
}
  0x19   :  { %s329_s6 = scalar_lea.vmem %s397_s15, 512  ;;  %p334_p12 = scmp.lt.s32.totalorder %s397_s15, %s397_s15 }
  0x1a   :  { %p330_p11 = scmp.ne.s32.totalorder %s397_s15, %s329_s6  ;;  %p335_p13 = scmp.lt.s32.totalorder %s329_s6, %s329_s6 }
  0x1c   :  { %p336_p0 = por %p335_p13, %p334_p12 }
  0x1e   :  { %p337_p1 = pnand %p336_p0, %p330_p11 }
  0x20   :  { %340 = shalt.err (!%p337_p1)
}
  0x21   :  { %s371_s0 = smov 128   ;;  %s372_s7 = smov 8  }
  0x22   :  { %32 = dma.hbm_to_vmem [thread:$0]  %s451_s1, 512, %s397_s15, [#allocation7], %s371_s0, %s371_s0, %s372_s7  }
  0x23   :  { %363 = dma.done.wait [#allocation4], 128  }
  0x24   :  { %364 = vsyncadd [#allocation4], 4294967168 }
  0x25   :  { %365 = dma.done.wait [#allocation7], 512  }
  0x26   :  { %366 = vsyncadd [#allocation7], 4294966784  ;;  %vm45_vm0 = vcmask 261120   ;;  %v373_v0 = vmov 0.0|0.0   ;;  %v374_v1 = vmov 0.0   ;;  %vm375_vm1 = vmmov 0  }
  0x27   :  { %277 = vmatprep.subr.bf16.mxu0 %v373_v0  ;;  %46 = vst.msk [vmem:[#allocation2] sm:$0xff] %vm45_vm0, %v374_v1  ;;  %269 = vmatprep.mubr.msk.f32.mxu0 %vm375_vm1, %v374_v1  ;;  %v49_v2 = vld [vmem:[#allocation6] sm:$0xff]  ;;  %v50_v3 = vld [vmem:[#allocation6 + $0x8] sm:$0xff]  ;;  %vm279_vm2 = vmpackc.low %vm45_vm0, %vm45_vm0  ;;  %s376_s11 = smov [#allocation8]   ;;  %vm228_vm3 = vcmask 57344  }
  0x28   :  { %272 = vmatprep.subr.mxu1 %v374_v1  ;;  %274 = vmatprep.mubr.msk.f32.mxu1 %vm375_vm1, %v374_v1  ;;  %v278_v4 = vpack.c.bf16 %v50_v3, %v49_v2  ;;  %v51_v5 = vld [vmem:[#allocation6 + $0x10] sm:$0xff]  ;;  %v52_v6 = vld [vmem:[#allocation6 + $0x18] sm:$0xff]  ;;  %s236_s12 = sshll.u32 %s376_s11, 4  ;;  %s237_s12 = int_to_ptr.vmem [resolvable:$true] %s236_s12 }
  0x29   :  { %v282_v7 = vpack.c.bf16 %v52_v6, %v51_v5  ;;  %v48_v8 = vld [vmem:[#allocation3] sm:$0xff]  ;;  %v151_v18 = vld [vmem:[%s452_s2] sm:$0x1]  ;;  %s341_s13 = scalar_lea.vmem %s237_s12, 16  ;;  %s345_s14 = scalar_lea.vmem %s237_s12, 32 }
  0x2a   :  { %280 = vmatpush3.bf16.xpose.msk.msra.mxu0 %vm279_vm2, %v278_v4  ;;  %p342_p2 = scmp.ne.s32.totalorder %s237_s12, %s341_s13  ;;  %p346_p3 = scmp.lt.s32.totalorder %s237_s12, %s237_s12 }
  0x2b   :  { %281 = vmatprep.subr.bf16.mxu0 %v373_v0  ;;  %p347_p4 = scmp.lt.s32.totalorder %s345_s14, %s341_s13 }
  0x2d   :  { %p348_p5 = por %p347_p4, %p346_p3 }
  0x2e   :  { %v47_v9 = vld [vmem:[#allocation2] sm:$0xff] }
  0x2f   :  { %p349_p6 = pnand %p348_p5, %p342_p2 }
  0x32   :  { %284 = vmatpush3.bf16.xpose.msk.msra.mxu0 %vm279_vm2, %v282_v7 }
  0x39   :  { %270 = vmatmul.mubr.msk.f32.vlgmr.msra.gmra.mrb[0].mxu0 %vm45_vm0, %v48_v8 }
 0x10c   :  { %v135_v10 = vpop.f32.mrb[0].mxu0 }
 0x10d   :  { %v139_v11 = vadd.f32 %v135_v10, %v47_v9  ;;  %v271_v12 = vpop.f32.mrb[1].mxu0 }
 0x10f   :  { %140 = vst.msk [vmem:[#allocation2] sm:$0xff] %vm45_vm0, %v139_v11 }
 0x116   :  { %v144_v13 = vld [vmem:[#allocation2] sm:$0xff] }
 0x117   :  { %v251_v14 = vmul.f32 -1.442695, %v144_v13 }
 0x119   :  { %293 = vpow2.f32 %v251_v14 }
 0x123   :  { %v294_v15 = vpop.eup %293 }
 0x124   :  { %v148_v16 = vadd.f32 1.0, %v294_v15 }
 0x126   :  { %295 = vrcp.f32 %v148_v16 }
 0x130   :  { %v296_v17 = vpop.eup %295 }
 0x131   :  { %273 = vmatpush3.xpose.msk.msra.mxu1 %vm45_vm0, %v296_v17 }
 0x134   :  { %275 = vmatmul.mubr.msk.f32.vlgmr.msra.gmra.mrb[0].mxu1 %vm45_vm0, %v151_v18 }
 0x207   :  { %v224_v19 = vpop.f32.mrb[0].mxu1 }
 0x208   :  { %v276_v20 = vpop.f32.mrb[1].mxu1  ;;  %229 = vst.msk [vmem:[#allocation8] sm:$0x1] %vm228_vm3, %v224_v19 }
 0x209   :  { %352 = shalt.err (!%p349_p6)
}
 0x20a   :  { %s353_s2 = scalar_lea.hbm %s453_s3, 16 }
 0x20b   :  { %p354_p7 = scmp.ne.s32.totalorder %s453_s3, %s353_s2  ;;  %p357_p8 = scmp.lt.u32.totalorder %s353_s2, %s453_s3 }
 0x20d   :  { %p359_p9 = pnand %p357_p8, %p354_p7 }
 0x20f   :  { %362 = shalt.err (!%p359_p9)
}
 0x210   :  { %239 = dma.vmem_to_hbm [thread:$0]  %s237_s12, 16, %s453_s3, [#allocation5]  }
 0x211   :  { %367 = dma.done.wait [#allocation5], 16  }
 0x212   :  { %368 = vsyncadd [#allocation5], 4294967280 }
 0x213   :  { %243 = vsyncpa [#allocation4], 1 }
 0x214   :  { %244 = vsyncpa [#allocation7], 1 }
 0x215   :  { %245 = vsyncpa [#allocation5], 1 }

</bundles_post_ra>
